<compile_context>
chip_gen: v6e
topology: v6e:2x2x1
jax: 0.10.0
libtpu: 0.0.40
codegen_flags: <defaults>
</compile_context>

<pallas_src>
import functools
from collections.abc import Iterable

import numpy as np
import jax
import jax.numpy as jnp
from jax import lax
from jax.experimental import pallas as pl
from jax.experimental.pallas import tpu as pltpu


# ----------------------------------------------------------------------------
# geometry helpers
# ----------------------------------------------------------------------------
_MAX_TILE_M = 16384          # lanes per grid step (multiple of 128)
_MAX_TERMS_PER_CALL = 16     # cap on batched terms per fused pallas_call
_VMEM_LIMIT = 32 * 1024 * 1024


def _round_up(x, m):
    return ((x + m - 1) // m) * m


def _geom(d, n_qudits, max_tile_m=_MAX_TILE_M):
    """Tiling of the state viewed as (2, d, M), M = d**(n-1).  No d padding."""
    M = d ** (n_qudits - 1)
    max_tile_m = max(128, _round_up(max_tile_m, 128))
    if M <= max_tile_m:
        tile_m = _round_up(M, 128)
        m_steps = 1
    else:
        k = -(-M // max_tile_m)                       # number of tiles (ceil)
        tile_m = min(_round_up(-(-M // k), 128), max_tile_m)
        m_steps = -(-M // tile_m)
    Mp = m_steps * tile_m
    return M, tile_m, Mp, m_steps


def _prep_state(qs, target, d, n, Mp):
    """(2, d,...,d) -> target qudit axis first, rest flattened: (2, d, Mp)."""
    M = d ** (n - 1)
    s = jnp.moveaxis(qs, 1 + target, 1).reshape(2, d, M).astype(jnp.float32)
    if Mp != M:
        s = jnp.pad(s, ((0, 0), (0, 0), (0, Mp - M)))
    return s


def _unprep_state(s_pad, target, d, n):
    M = d ** (n - 1)
    s = s_pad[:, :, :M].reshape((2,) + (d,) * n)
    return jnp.moveaxis(s, 1, 1 + target)


def _reprep(s_pad, old_target, new_target, d, n, Mp):
    # unprep + prep compose into a single XLA transpose/copy between kernels.
    return _prep_state(_unprep_state(s_pad, old_target, d, n),
                       new_target, d, n, Mp)


def _gate_values(gate):
    """Hashable nested tuples of the gate's (re, im) entries."""
    return (tuple(map(tuple, gate._re.astype(np.float64).tolist())),
            tuple(map(tuple, gate._im.astype(np.float64).tolist())))


# ----------------------------------------------------------------------------
# trace-time helpers for building the VPU multiply-add chains
# ----------------------------------------------------------------------------
def _add(a, b):
    return b if a is None else a + b


def _axpy(a, scale, x):
    if scale == 1.0:
        term = x
    elif scale == -1.0:
        term = -x
    else:
        term = scale * x
    return term if a is None else a + term


# ----------------------------------------------------------------------------
# Pallas kernels
# ----------------------------------------------------------------------------
@functools.lru_cache(maxsize=None)
def _make_apply_kernel(d, gval):
    """Apply one d x d gate to a (2, d, tile_m) state tile (VPU only)."""
    gre, gim = gval

    def kernel(s_ref, o_ref):
        sr = s_ref[0]                      # (d, tile_m)
        si = s_ref[1]
        rows_r, rows_i = [], []
        for i in range(d):
            tr = None
            ti = None
            for j in range(d):
                gr = gre[i][j]
                gi = gim[i][j]
                if gr == 0.0 and gi == 0.0:
                    continue               # statically skip zero entries
                srj = sr[j:j + 1, :]
                sij = si[j:j + 1, :]
                if gr != 0.0:
                    tr = _axpy(tr, gr, srj)
                    ti = _axpy(ti, gr, sij)
                if gi != 0.0:
                    tr = _axpy(tr, -gi, sij)
                    ti = _axpy(ti, gi, srj)
            zero = jnp.zeros_like(sr[0:1, :])
            rows_r.append(tr if tr is not None else zero)
            rows_i.append(ti if ti is not None else zero)
        o_ref[0] = jnp.concatenate(rows_r, axis=0)
        o_ref[1] = jnp.concatenate(rows_i, axis=0)

    return kernel


@functools.lru_cache(maxsize=None)
def _make_fused_kernel(d, T, gvals, self_overlap):
    """Fused gate-apply + expectation for T gates sharing one target qudit.

    out[c*8, t] = sum_lanes sum_i bra_re[i]*(G_t ket)_re[i] + bra_im[i]*(G_t ket)_im[i]
    Per-step accumulation is elementwise into a (T, tile_m) VMEM scratch; the
    single cross-lane reduce runs on the last grid step of each split.
    """

    def kernel(*refs):
        if self_overlap:
            state_ref, out_ref, acc_ref = refs
            bra_ref = ket_ref = state_ref
        else:
            bra_ref, ket_ref, out_ref, acc_ref = refs

        step = pl.program_id(1)

        @pl.when(step == 0)
        def _init():
            acc_ref[...] = jnp.zeros_like(acc_ref)

        kr = ket_ref[0]                    # (d, tile_m)
        ki = ket_ref[1]
        br = kr if self_overlap else bra_ref[0]
        bi = ki if self_overlap else bra_ref[1]

        for t in range(T):
            gre, gim = gvals[t]
            contrib = None
            for i in range(d):
                tr = None
                ti = None
                for j in range(d):
                    gr = gre[i][j]
                    gi = gim[i][j]
                    if gr == 0.0 and gi == 0.0:
                        continue
                    krj = kr[j:j + 1, :]
                    kij = ki[j:j + 1, :]
                    if gr != 0.0:
                        tr = _axpy(tr, gr, krj)
                        ti = _axpy(ti, gr, kij)
                    if gi != 0.0:
                        tr = _axpy(tr, -gi, kij)
                        ti = _axpy(ti, gi, krj)
                row = None
                if tr is not None:
                    row = _add(row, br[i:i + 1, :] * tr)
                if ti is not None:
                    row = _add(row, bi[i:i + 1, :] * ti)
                contrib = _add(contrib, row)
            if contrib is not None:
                acc_ref[t:t + 1, :] += contrib

        @pl.when(step == pl.num_programs(1) - 1)
        def _finalize():
            rows = lax.broadcasted_iota(jnp.int32, (8, 128), 0)
            cols = lax.broadcasted_iota(jnp.int32, (8, 128), 1)
            res = jnp.zeros((8, 128), jnp.float32)
            for t in range(T):
                s_t = jnp.sum(acc_ref[t:t + 1, :])
                res = jnp.where(jnp.logical_and(rows == 0, cols == t), s_t, res)
            out_ref[...] = res

    return kernel


# ----------------------------------------------------------------------------
# Pallas wrappers
# ----------------------------------------------------------------------------
def _apply_gate_prepped(state_pad, gate, *, d, tile_m, Mp, m_steps):
    """Write-back gate application on the (2, d, Mp) flattened state."""
    kernel = _make_apply_kernel(d, _gate_values(gate))
    return pl.pallas_call(
        kernel,
        out_shape=jax.ShapeDtypeStruct((2, d, Mp), jnp.float32),
        grid=(m_steps,),
        in_specs=[pl.BlockSpec((2, d, tile_m), lambda i: (0, 0, i))],
        out_specs=pl.BlockSpec((2, d, tile_m), lambda i: (0, 0, i)),
        input_output_aliases={0: 0},
        compiler_params=pltpu.CompilerParams(
            dimension_semantics=("parallel",),
            vmem_limit_bytes=_VMEM_LIMIT),
    )(state_pad)


def _fused_group_expectation(gates, bra_pad, ket_pad, *, d, tile_m, Mp, m_steps):
    """Sum_lanes Re<bra| G_t |ket> for T gates sharing one target qudit.

    ket_pad=None means bra == ket: only one state operand is DMA'd from HBM.
    Returns a (T,) array.
    """
    T = len(gates)
    self_overlap = ket_pad is None
    gvals = tuple(_gate_values(g) for g in gates)
    kernel = _make_fused_kernel(d, T, gvals, self_overlap)

    # 2-way split of the lane range -> megacore on v7x (disjoint output block
    # per split); sequential (and still correct) on single-core chips.
    n_splits = 2 if (m_steps >= 2 and m_steps % 2 == 0) else 1
    spc = m_steps // n_splits

    state_spec = pl.BlockSpec((2, d, tile_m),
                              lambda c, i, spc=spc: (0, 0, c * spc + i))
    out_spec = pl.BlockSpec((8, 128), lambda c, i: (c, 0))
    if self_overlap:
        in_specs = [state_spec]
        operands = (bra_pad,)
    else:
        in_specs = [state_spec, state_spec]
        operands = (bra_pad, ket_pad)

    out = pl.pallas_call(
        kernel,
        out_shape=jax.ShapeDtypeStruct((n_splits * 8, 128), jnp.float32),
        grid=(n_splits, spc),
        in_specs=in_specs,
        out_specs=out_spec,
        scratch_shapes=[pltpu.VMEM((T, tile_m), jnp.float32)],
        compiler_params=pltpu.CompilerParams(
            dimension_semantics=("parallel", "arbitrary"),
            vmem_limit_bytes=_VMEM_LIMIT),
    )(*operands)
    return out.reshape(n_splits, 8, 128)[:, 0, :T].sum(axis=0)   # (T,)


# ----------------------------------------------------------------------------
# Minimal qudit gate library (deterministic, in-script)
# ----------------------------------------------------------------------------
class GateBase:
    """Single-qudit gate on a dim-d qudit (embedded 2-level Pauli)."""

    def __init__(self, name, mat_re, mat_im, dim):
        self.name = name
        self.dim = dim
        self._re = np.asarray(mat_re, np.float32)
        self._im = np.asarray(mat_im, np.float32)
        self.is_real = bool(np.all(self._im == 0.0))
        self.target = None

    def on(self, obj_qudit):
        self.target = int(obj_qudit)
        return self

    @property
    def mat_re(self):
        return jnp.asarray(self._re)

    @property
    def mat_im(self):
        return jnp.asarray(self._im)

    def __call__(self, qs):
        d = self.dim
        n = qs.ndim - 1
        _, tile_m, Mp, m_steps = _geom(d, n)
        s = _prep_state(qs, self.target, d, n, Mp)
        out = _apply_gate_prepped(s, self, d=d, tile_m=tile_m, Mp=Mp,
                                  m_steps=m_steps)
        return _unprep_state(out, self.target, d, n)


def X(i, j, d):
    re = np.eye(d, dtype=np.float32)
    re[i, i] = 0.0
    re[j, j] = 0.0
    re[i, j] = 1.0
    re[j, i] = 1.0
    return GateBase(f"X({i},{j},{d})", re, np.zeros((d, d), np.float32), d)


def Y(i, j, d):
    re = np.eye(d, dtype=np.float32)
    re[i, i] = 0.0
    re[j, j] = 0.0
    im = np.zeros((d, d), np.float32)
    im[i, j] = -1.0
    im[j, i] = 1.0
    return GateBase(f"Y({i},{j},{d})", re, im, d)


def Z(i, j, d):
    re = np.eye(d, dtype=np.float32)
    re[j, j] = -1.0
    return GateBase(f"Z({i},{j},{d})", re, np.zeros((d, d), np.float32), d)


# ----------------------------------------------------------------------------
# Expectation module (mirrors the PyTorch forward)
# ----------------------------------------------------------------------------
class Expectation:
    """ham = [(1.0, Z(1,2,3).on(1)), (2.0, X(1, 0, 3).on(2))]"""

    def __init__(self, ham, max_tile_m=_MAX_TILE_M):
        self.ham = ham
        self.max_tile_m = max_tile_m
        self._forward_jit = jax.jit(self._forward)

    def __call__(self, qs):
        return self._forward_jit(qs)

    def _forward(self, qs):
        d = int(qs.shape[1])
        n = qs.ndim - 1
        _, tile_m, Mp, m_steps = _geom(d, n, self.max_tile_m)

        terms = []
        for coef, gates in self.ham:
            if isinstance(gates, GateBase):
                gl = [gates]
            elif isinstance(gates, Iterable):
                gl = list(gates)
            else:
                raise ValueError(
                    f"Gates should be iterable or a single GateBase, got {type(gates)}.")
            terms.append((coef, gl))

        results = [None] * len(terms)
        bra_cache = {}

        def bra_for(target):
            if target not in bra_cache:
                bra_cache[target] = _prep_state(qs, target, d, n, Mp)
            return bra_cache[target]

        # 1) empty terms (identity observable) + group single-gate terms by target.
        single_groups = {}
        for idx, (_, gl) in enumerate(terms):
            if len(gl) == 0:
                results[idx] = jnp.sum(qs[0] * qs[0]) + jnp.sum(qs[1] * qs[1])
            elif len(gl) == 1:
                single_groups.setdefault(gl[0].target, []).append(idx)

        # 2) batched single-gate groups: one HBM read of the state per group.
        for target, idxs in single_groups.items():
            bra = bra_for(target)
            for s in range(0, len(idxs), _MAX_TERMS_PER_CALL):
                chunk = idxs[s:s + _MAX_TERMS_PER_CALL]
                gates = [terms[i][1][0] for i in chunk]
                vals = _fused_group_expectation(
                    gates, bra, None,
                    d=d, tile_m=tile_m, Mp=Mp, m_steps=m_steps)
                for k, i in enumerate(chunk):
                    results[i] = vals[k]

        # 3) multi-gate terms: apply all but the last gate with write-back
        #    (state kept in flattened layout between gates), fuse the last
        #    gate with the <bra|.> reduction.
        for idx, (_, gl) in enumerate(terms):
            if len(gl) <= 1:
                continue
            cur_t = gl[0].target
            ket = _prep_state(qs, cur_t, d, n, Mp)
            for g in gl[:-1]:
                if g.target != cur_t:
                    ket = _reprep(ket, cur_t, g.target, d, n, Mp)
                    cur_t = g.target
                ket = _apply_gate_prepped(ket, g, d=d, tile_m=tile_m, Mp=Mp,
                                          m_steps=m_steps)
            last = gl[-1]
            if cur_t != last.target:
                ket = _reprep(ket, cur_t, last.target, d, n, Mp)
            vals = _fused_group_expectation(
                [last], bra_for(last.target), ket,
                d=d, tile_m=tile_m, Mp=Mp, m_steps=m_steps)
            results[idx] = vals[0]

        return jnp.stack([terms[i][0] * results[i] for i in range(len(terms))])


# ----------------------------------------------------------------------------
# Pure-JAX reference (real arithmetic)
# ----------------------------------------------------------------------------
def reference_expectation(qs, ham):
    d = qs.shape[1]
    n = qs.ndim - 1
    shp = (d,) * n
    res = []
    for coef, gates in ham:
        gate_list = [gates] if isinstance(gates, GateBase) else list(gates)
        re2, im2 = qs[0], qs[1]
        for g in gate_list:
            r = jnp.moveaxis(re2, g.target, 0).reshape(d, -1)
            i_ = jnp.moveaxis(im2, g.target, 0).reshape(d, -1)
            nr = g.mat_re @ r - g.mat_im @ i_
            ni = g.mat_re @ i_ + g.mat_im @ r
            re2 = jnp.moveaxis(nr.reshape(shp), 0, g.target)
            im2 = jnp.moveaxis(ni.reshape(shp), 0, g.target)
        res.append(coef * (jnp.sum(qs[0] * re2) + jnp.sum(qs[1] * im2)))
    return jnp.stack(res)


# ----------------------------------------------------------------------------
if __name__ == "__main__":
    dim = 3          # qudit dimension

    key = jax.random.PRNGKey(0)
    k1, k2, k3, k4 = jax.random.split(key, 4)

    # --- config 1: the original small example (single-tile grid) ------------
    n_qudits = 5     # 3**5 = 243 amplitudes
    shp = (dim,) * n_qudits
    re = jax.random.normal(k1, shp, dtype=jnp.float32)
    im = jax.random.normal(k2, shp, dtype=jnp.float32)
    norm = jnp.sqrt(jnp.sum(re * re + im * im))
    qs = jnp.stack([re / norm, im / norm])   # (2, 3, 3, 3, 3, 3)

    ham = [
        (1.0, Z(1, 2, 3).on(1)),                      # real diagonal gate
        (2.0, X(1, 0, 3).on(2)),                      # real gate
        (0.5, [Y(0, 2, 3).on(0), X(1, 2, 3).on(3)]),  # complex gate + iterable
    ]
    model = Expectation(ham)
    out = jax.block_until_ready(model(qs))
    ref = jax.block_until_ready(reference_expectation(qs, ham))
    assert out.shape == (len(ham),)
    assert jnp.allclose(out, ref, atol=1e-4, rtol=1e-4), (out, ref)

    # --- config 2: exercises term batching (two terms on the same qudit),
    #     the multi-tile grid, the 2-way parallel split and the empty term ---
    n_qudits2 = 7    # 3**7 = 2187 amplitudes, M = 729 -> 6 tiles of 128 lanes
    shp2 = (dim,) * n_qudits2
    re2 = jax.random.normal(k3, shp2, dtype=jnp.float32)
    im2 = jax.random.normal(k4, shp2, dtype=jnp.float32)
    norm2 = jnp.sqrt(jnp.sum(re2 * re2 + im2 * im2))
    qs2 = jnp.stack([re2 / norm2, im2 / norm2])

    ham2 = [
        (1.0, Z(0, 1, 3).on(2)),
        (0.7, X(0, 2, 3).on(2)),     # same target as above -> batched (T=2)
        (1.3, Y(1, 2, 3).on(0)),
        (0.25, []),                  # identity observable: <psi|psi>
    ]
    model2 = Expectation(ham2, max_tile_m=128)
    out2 = jax.block_until_ready(model2(qs2))
    ref2 = jax.block_until_ready(reference_expectation(qs2, ham2))
    assert out2.shape == (len(ham2),)
    assert jnp.allclose(out2, ref2, atol=1e-4, rtol=1e-4), (out2, ref2)

    print("KERNEL_OK")
</pallas_src>

<mosaic_0001>
module attributes {stable_mosaic.version = 11 : i64} {
  func.func @kernel(%arg0: i32, %arg1: memref<2x3x128xf32, #tpu.memory_space<vmem>>, %arg2: memref<2x3x128xf32, #tpu.memory_space<vmem>>) attributes {dimension_semantics = [#tpu.dimension_semantics<parallel>], iteration_bounds = array<i64: 1>, scalar_prefetch = 0 : i64, scratch_operands = 0 : i64, tpu.core_type = #tpu.core_type<tc>, window_params = [{transform_indices = @transform_0, window_bounds = array<i64: 2, 3, 128>}, {transform_indices = @transform_1, window_bounds = array<i64: 2, 3, 128>}]} {
    %c0 = arith.constant 0 : index
    %c0_0 = arith.constant 0 : index
    %c0_1 = arith.constant 0 : index
    %0 = vector.load %arg1[%c0, %c0_0, %c0_1] : memref<2x3x128xf32, #tpu.memory_space<vmem>>, vector<1x3x128xf32>
    %1 = vector.shape_cast %0 : vector<1x3x128xf32> to vector<3x128xf32>
    %c1 = arith.constant 1 : index
    %c0_2 = arith.constant 0 : index
    %c0_3 = arith.constant 0 : index
    %2 = vector.load %arg1[%c1, %c0_2, %c0_3] : memref<2x3x128xf32, #tpu.memory_space<vmem>>, vector<1x3x128xf32>
    %3 = vector.shape_cast %2 : vector<1x3x128xf32> to vector<3x128xf32>
    %4 = vector.extract_strided_slice %1 {offsets = [2, 0], sizes = [1, 128], strides = [1, 1]} : vector<3x128xf32> to vector<1x128xf32>
    %5 = vector.extract_strided_slice %3 {offsets = [2, 0], sizes = [1, 128], strides = [1, 1]} : vector<3x128xf32> to vector<1x128xf32>
    %cst = arith.constant 0.000000e+00 : f32
    %6 = vector.broadcast %cst : f32 to vector<1x128xf32>
    %7 = arith.subf %6, %4 : vector<1x128xf32>
    %8 = vector.extract_strided_slice %1 {offsets = [1, 0], sizes = [1, 128], strides = [1, 1]} : vector<3x128xf32> to vector<1x128xf32>
    %9 = vector.extract_strided_slice %3 {offsets = [1, 0], sizes = [1, 128], strides = [1, 1]} : vector<3x128xf32> to vector<1x128xf32>
    %10 = vector.extract_strided_slice %1 {offsets = [0, 0], sizes = [1, 128], strides = [1, 1]} : vector<3x128xf32> to vector<1x128xf32>
    %11 = vector.extract_strided_slice %3 {offsets = [0, 0], sizes = [1, 128], strides = [1, 1]} : vector<3x128xf32> to vector<1x128xf32>
    %cst_4 = arith.constant 0.000000e+00 : f32
    %12 = vector.broadcast %cst_4 : f32 to vector<1x128xf32>
    %13 = arith.subf %12, %11 : vector<1x128xf32>
    %14 = tpu.concatenate %5, %8, %13 in 0 : vector<1x128xf32>, vector<1x128xf32>, vector<1x128xf32> -> vector<3x128xf32>
    %c0_5 = arith.constant 0 : index
    %c0_6 = arith.constant 0 : index
    %c0_7 = arith.constant 0 : index
    %15 = vector.load %arg2[%c0_5, %c0_6, %c0_7] : memref<2x3x128xf32, #tpu.memory_space<vmem>>, vector<1x3x128xf32>
    %16 = vector.shape_cast %15 : vector<1x3x128xf32> to vector<3x128xf32>
    %17 = vector.shape_cast %14 : vector<3x128xf32> to vector<1x3x128xf32>
    tpu.vector_store %arg2[%c0_5, %c0_6, %c0_7], %17 {strides = array<i32>} : memref<2x3x128xf32, #tpu.memory_space<vmem>>, vector<1x3x128xf32>,
    %18 = tpu.concatenate %7, %9, %10 in 0 : vector<1x128xf32>, vector<1x128xf32>, vector<1x128xf32> -> vector<3x128xf32>
    %c1_8 = arith.constant 1 : index
    %c0_9 = arith.constant 0 : index
    %c0_10 = arith.constant 0 : index
    %19 = vector.load %arg2[%c1_8, %c0_9, %c0_10] : memref<2x3x128xf32, #tpu.memory_space<vmem>>, vector<1x3x128xf32>
    %20 = vector.shape_cast %19 : vector<1x3x128xf32> to vector<3x128xf32>
    %21 = vector.shape_cast %18 : vector<3x128xf32> to vector<1x3x128xf32>
    tpu.vector_store %arg2[%c1_8, %c0_9, %c0_10], %21 {strides = array<i32>} : memref<2x3x128xf32, #tpu.memory_space<vmem>>, vector<1x3x128xf32>,
    return
  }
  func.func @transform_0(%arg0: i32) -> (i32, i32, i32) {
    %c0_i32 = arith.constant 0 : i32
    %c0_i32_0 = arith.constant 0 : i32
    %c0_i32_1 = arith.constant 0 : i32
    return %c0_i32, %c0_i32_0, %arg0 : i32, i32, i32
  }
  func.func @transform_1(%arg0: i32) -> (i32, i32, i32) {
    %c0_i32 = arith.constant 0 : i32
    %c0_i32_0 = arith.constant 0 : i32
    %c0_i32_1 = arith.constant 0 : i32
    return %c0_i32, %c0_i32_0, %arg0 : i32, i32, i32
  }
}

module attributes {stable_mosaic.version = 11 : i64} {
  func.func @kernel(%arg0: i32, %arg1: i32, %arg2: memref<2x3x128xf32, #tpu.memory_space<vmem>>, %arg3: memref<2x3x128xf32, #tpu.memory_space<vmem>>, %arg4: memref<8x128xf32, #tpu.memory_space<vmem>>, %arg5: memref<1x128xf32, #tpu.memory_space<vmem>>) attributes {dimension_semantics = [#tpu.dimension_semantics<parallel>, #tpu.dimension_semantics<arbitrary>], iteration_bounds = array<i64: 1, 1>, scalar_prefetch = 0 : i64, scratch_operands = 1 : i64, tpu.core_type = #tpu.core_type<tc>, window_params = [{transform_indices = @transform_0, window_bounds = array<i64: 2, 3, 128>}, {transform_indices = @transform_1, window_bounds = array<i64: 2, 3, 128>}, {transform_indices = @transform_2, window_bounds = array<i64: 8, 128>}]} {
    %c0_i32 = arith.constant 0 : i32
    %0 = arith.cmpi eq, %arg1, %c0_i32 : i32
    %1 = arith.extui %0 : i1 to i32
    %c0_i32_0 = arith.constant 0 : i32
    %2 = arith.cmpi ne, %1, %c0_i32_0 : i32
    scf.if %2 {
      %cst = arith.constant 0.000000e+00 : f32
      %40 = vector.broadcast %cst : f32 to vector<1x128xf32>
      %c0_17 = arith.constant 0 : index
      %c0_18 = arith.constant 0 : index
      %41 = vector.load %arg5[%c0_17, %c0_18] : memref<1x128xf32, #tpu.memory_space<vmem>>, vector<1x128xf32>
      tpu.vector_store %arg5[%c0_17, %c0_18], %40 {strides = array<i32>} : memref<1x128xf32, #tpu.memory_space<vmem>>, vector<1x128xf32>,
    } else {
    }
    %c0 = arith.constant 0 : index
    %c0_1 = arith.constant 0 : index
    %c0_2 = arith.constant 0 : index
    %3 = vector.load %arg3[%c0, %c0_1, %c0_2] : memref<2x3x128xf32, #tpu.memory_space<vmem>>, vector<1x3x128xf32>
    %4 = vector.shape_cast %3 : vector<1x3x128xf32> to vector<3x128xf32>
    %c1 = arith.constant 1 : index
    %c0_3 = arith.constant 0 : index
    %c0_4 = arith.constant 0 : index
    %5 = vector.load %arg3[%c1, %c0_3, %c0_4] : memref<2x3x128xf32, #tpu.memory_space<vmem>>, vector<1x3x128xf32>
    %6 = vector.shape_cast %5 : vector<1x3x128xf32> to vector<3x128xf32>
    %c0_5 = arith.constant 0 : index
    %c0_6 = arith.constant 0 : index
    %c0_7 = arith.constant 0 : index
    %7 = vector.load %arg2[%c0_5, %c0_6, %c0_7] : memref<2x3x128xf32, #tpu.memory_space<vmem>>, vector<1x3x128xf32>
    %8 = vector.shape_cast %7 : vector<1x3x128xf32> to vector<3x128xf32>
    %c1_8 = arith.constant 1 : index
    %c0_9 = arith.constant 0 : index
    %c0_10 = arith.constant 0 : index
    %9 = vector.load %arg2[%c1_8, %c0_9, %c0_10] : memref<2x3x128xf32, #tpu.memory_space<vmem>>, vector<1x3x128xf32>
    %10 = vector.shape_cast %9 : vector<1x3x128xf32> to vector<3x128xf32>
    %11 = vector.extract_strided_slice %4 {offsets = [0, 0], sizes = [1, 128], strides = [1, 1]} : vector<3x128xf32> to vector<1x128xf32>
    %12 = vector.extract_strided_slice %6 {offsets = [0, 0], sizes = [1, 128], strides = [1, 1]} : vector<3x128xf32> to vector<1x128xf32>
    %13 = vector.extract_strided_slice %8 {offsets = [0, 0], sizes = [1, 128], strides = [1, 1]} : vector<3x128xf32> to vector<1x128xf32>
    %14 = arith.mulf %13, %11 : vector<1x128xf32>
    %15 = vector.extract_strided_slice %10 {offsets = [0, 0], sizes = [1, 128], strides = [1, 1]} : vector<3x128xf32> to vector<1x128xf32>
    %16 = arith.mulf %15, %12 : vector<1x128xf32>
    %17 = arith.addf %14, %16 : vector<1x128xf32>
    %18 = vector.extract_strided_slice %4 {offsets = [2, 0], sizes = [1, 128], strides = [1, 1]} : vector<3x128xf32> to vector<1x128xf32>
    %19 = vector.extract_strided_slice %6 {offsets = [2, 0], sizes = [1, 128], strides = [1, 1]} : vector<3x128xf32> to vector<1x128xf32>
    %20 = vector.extract_strided_slice %8 {offsets = [1, 0], sizes = [1, 128], strides = [1, 1]} : vector<3x128xf32> to vector<1x128xf32>
    %21 = arith.mulf %20, %18 : vector<1x128xf32>
    %22 = vector.extract_strided_slice %10 {offsets = [1, 0], sizes = [1, 128], strides = [1, 1]} : vector<3x128xf32> to vector<1x128xf32>
    %23 = arith.mulf %22, %19 : vector<1x128xf32>
    %24 = arith.addf %21, %23 : vector<1x128xf32>
    %25 = arith.addf %17, %24 : vector<1x128xf32>
    %26 = vector.extract_strided_slice %4 {offsets = [1, 0], sizes = [1, 128], strides = [1, 1]} : vector<3x128xf32> to vector<1x128xf32>
    %27 = vector.extract_strided_slice %6 {offsets = [1, 0], sizes = [1, 128], strides = [1, 1]} : vector<3x128xf32> to vector<1x128xf32>
    %28 = vector.extract_strided_slice %8 {offsets = [2, 0], sizes = [1, 128], strides = [1, 1]} : vector<3x128xf32> to vector<1x128xf32>
    %29 = arith.mulf %28, %26 : vector<1x128xf32>
    %30 = vector.extract_strided_slice %10 {offsets = [2, 0], sizes = [1, 128], strides = [1, 1]} : vector<3x128xf32> to vector<1x128xf32>
    %31 = arith.mulf %30, %27 : vector<1x128xf32>
    %32 = arith.addf %29, %31 : vector<1x128xf32>
    %33 = arith.addf %25, %32 : vector<1x128xf32>
    %c0_11 = arith.constant 0 : index
    %c0_12 = arith.constant 0 : index
    %34 = vector.load %arg5[%c0_11, %c0_12] : memref<1x128xf32, #tpu.memory_space<vmem>>, vector<1x128xf32>
    %35 = arith.addf %34, %33 : vector<1x128xf32>
    %c0_13 = arith.constant 0 : index
    %c0_14 = arith.constant 0 : index
    %36 = vector.load %arg5[%c0_13, %c0_14] : memref<1x128xf32, #tpu.memory_space<vmem>>, vector<1x128xf32>
    tpu.vector_store %arg5[%c0_13, %c0_14], %35 {strides = array<i32>} : memref<1x128xf32, #tpu.memory_space<vmem>>, vector<1x128xf32>,
    %c0_i32_15 = arith.constant 0 : i32
    %37 = arith.cmpi eq, %arg1, %c0_i32_15 : i32
    %38 = arith.extui %37 : i1 to i32
    %c0_i32_16 = arith.constant 0 : i32
    %39 = arith.cmpi ne, %38, %c0_i32_16 : i32
    scf.if %39 {
      %40 = tpu.iota {dimensions = array<i32: 0>} : vector<8x128xi32>
      %41 = tpu.iota {dimensions = array<i32: 1>} : vector<8x128xi32>
      %cst = arith.constant 0.000000e+00 : f32
      %42 = vector.broadcast %cst : f32 to vector<8x128xf32>
      %c0_17 = arith.constant 0 : index
      %c0_18 = arith.constant 0 : index
      %43 = vector.load %arg5[%c0_17, %c0_18] : memref<1x128xf32, #tpu.memory_space<vmem>>, vector<1x128xf32>
      %44 = vector.shape_cast %43 : vector<1x128xf32> to vector<1x1x128xf32>
      %cst_19 = arith.constant dense<0.000000e+00> : vector<1xf32>
      %45 = vector.multi_reduction <add>, %44, %cst_19 [1, 2] : vector<1x1x128xf32> to vector<1xf32>
      %46 = vector.shape_cast %45 : vector<1xf32> to vector<1x1x1xf32>
      %47 = vector.extract %46[0, 0, 0] : f32 from vector<1x1x1xf32>
      %c0_i32_20 = arith.constant 0 : i32
      %48 = vector.broadcast %c0_i32_20 : i32 to vector<8x128xi32>
      %49 = arith.cmpi eq, %40, %48 : vector<8x128xi32>
      %c0_i32_21 = arith.constant 0 : i32
      %50 = vector.broadcast %c0_i32_21 : i32 to vector<8x128xi32>
      %51 = arith.cmpi eq, %41, %50 : vector<8x128xi32>
      %52 = arith.andi %49, %51 : vector<8x128xi1>
      %53 = vector.broadcast %47 : f32 to vector<8x128xf32>
      %54 = arith.select %52, %53, %42 : vector<8x128xi1>, vector<8x128xf32>
      %c0_22 = arith.constant 0 : index
      %c0_23 = arith.constant 0 : index
      %55 = vector.load %arg4[%c0_22, %c0_23] : memref<8x128xf32, #tpu.memory_space<vmem>>, vector<8x128xf32>
      tpu.vector_store %arg4[%c0_22, %c0_23], %54 {strides = array<i32>} : memref<8x128xf32, #tpu.memory_space<vmem>>, vector<8x128xf32>,
    } else {
    }
    return
  }
  func.func @transform_0(%arg0: i32, %arg1: i32) -> (i32, i32, i32) {
    %c1_i32 = arith.constant 1 : i32
    %0 = arith.muli %arg0, %c1_i32 : i32
    %1 = arith.addi %0, %arg1 : i32
    %c0_i32 = arith.constant 0 : i32
    %c0_i32_0 = arith.constant 0 : i32
    %c0_i32_1 = arith.constant 0 : i32
    return %c0_i32, %c0_i32_0, %1 : i32, i32, i32
  }
  func.func @transform_1(%arg0: i32, %arg1: i32) -> (i32, i32, i32) {
    %c1_i32 = arith.constant 1 : i32
    %0 = arith.muli %arg0, %c1_i32 : i32
    %1 = arith.addi %0, %arg1 : i32
    %c0_i32 = arith.constant 0 : i32
    %c0_i32_0 = arith.constant 0 : i32
    %c0_i32_1 = arith.constant 0 : i32
    return %c0_i32, %c0_i32_0, %1 : i32, i32, i32
  }
  func.func @transform_2(%arg0: i32, %arg1: i32) -> (i32, i32) {
    %c0_i32 = arith.constant 0 : i32
    %c0_i32_0 = arith.constant 0 : i32
    return %arg0, %c0_i32 : i32, i32
  }
}

module attributes {stable_mosaic.version = 11 : i64} {
  func.func @kernel(%arg0: i32, %arg1: i32, %arg2: memref<2x3x128xf32, #tpu.memory_space<vmem>>, %arg3: memref<8x128xf32, #tpu.memory_space<vmem>>, %arg4: memref<1x128xf32, #tpu.memory_space<vmem>>) attributes {dimension_semantics = [#tpu.dimension_semantics<parallel>, #tpu.dimension_semantics<arbitrary>], iteration_bounds = array<i64: 1, 1>, scalar_prefetch = 0 : i64, scratch_operands = 1 : i64, tpu.core_type = #tpu.core_type<tc>, window_params = [{transform_indices = @transform_0, window_bounds = array<i64: 2, 3, 128>}, {transform_indices = @transform_1, window_bounds = array<i64: 8, 128>}]} {
    %c0_i32 = arith.constant 0 : i32
    %0 = arith.cmpi eq, %arg1, %c0_i32 : i32
    %1 = arith.extui %0 : i1 to i32
    %c0_i32_0 = arith.constant 0 : i32
    %2 = arith.cmpi ne, %1, %c0_i32_0 : i32
    scf.if %2 {
      %cst = arith.constant 0.000000e+00 : f32
      %36 = vector.broadcast %cst : f32 to vector<1x128xf32>
      %c0_11 = arith.constant 0 : index
      %c0_12 = arith.constant 0 : index
      %37 = vector.load %arg4[%c0_11, %c0_12] : memref<1x128xf32, #tpu.memory_space<vmem>>, vector<1x128xf32>
      tpu.vector_store %arg4[%c0_11, %c0_12], %36 {strides = array<i32>} : memref<1x128xf32, #tpu.memory_space<vmem>>, vector<1x128xf32>,
    } else {
    }
    %c0 = arith.constant 0 : index
    %c0_1 = arith.constant 0 : index
    %c0_2 = arith.constant 0 : index
    %3 = vector.load %arg2[%c0, %c0_1, %c0_2] : memref<2x3x128xf32, #tpu.memory_space<vmem>>, vector<1x3x128xf32>
    %4 = vector.shape_cast %3 : vector<1x3x128xf32> to vector<3x128xf32>
    %c1 = arith.constant 1 : index
    %c0_3 = arith.constant 0 : index
    %c0_4 = arith.constant 0 : index
    %5 = vector.load %arg2[%c1, %c0_3, %c0_4] : memref<2x3x128xf32, #tpu.memory_space<vmem>>, vector<1x3x128xf32>
    %6 = vector.shape_cast %5 : vector<1x3x128xf32> to vector<3x128xf32>
    %7 = vector.extract_strided_slice %4 {offsets = [1, 0], sizes = [1, 128], strides = [1, 1]} : vector<3x128xf32> to vector<1x128xf32>
    %8 = vector.extract_strided_slice %6 {offsets = [1, 0], sizes = [1, 128], strides = [1, 1]} : vector<3x128xf32> to vector<1x128xf32>
    %9 = vector.extract_strided_slice %4 {offsets = [0, 0], sizes = [1, 128], strides = [1, 1]} : vector<3x128xf32> to vector<1x128xf32>
    %10 = arith.mulf %9, %7 : vector<1x128xf32>
    %11 = vector.extract_strided_slice %6 {offsets = [0, 0], sizes = [1, 128], strides = [1, 1]} : vector<3x128xf32> to vector<1x128xf32>
    %12 = arith.mulf %11, %8 : vector<1x128xf32>
    %13 = arith.addf %10, %12 : vector<1x128xf32>
    %14 = vector.extract_strided_slice %4 {offsets = [0, 0], sizes = [1, 128], strides = [1, 1]} : vector<3x128xf32> to vector<1x128xf32>
    %15 = vector.extract_strided_slice %6 {offsets = [0, 0], sizes = [1, 128], strides = [1, 1]} : vector<3x128xf32> to vector<1x128xf32>
    %16 = vector.extract_strided_slice %4 {offsets = [1, 0], sizes = [1, 128], strides = [1, 1]} : vector<3x128xf32> to vector<1x128xf32>
    %17 = arith.mulf %16, %14 : vector<1x128xf32>
    %18 = vector.extract_strided_slice %6 {offsets = [1, 0], sizes = [1, 128], strides = [1, 1]} : vector<3x128xf32> to vector<1x128xf32>
    %19 = arith.mulf %18, %15 : vector<1x128xf32>
    %20 = arith.addf %17, %19 : vector<1x128xf32>
    %21 = arith.addf %13, %20 : vector<1x128xf32>
    %22 = vector.extract_strided_slice %4 {offsets = [2, 0], sizes = [1, 128], strides = [1, 1]} : vector<3x128xf32> to vector<1x128xf32>
    %23 = vector.extract_strided_slice %6 {offsets = [2, 0], sizes = [1, 128], strides = [1, 1]} : vector<3x128xf32> to vector<1x128xf32>
    %24 = vector.extract_strided_slice %4 {offsets = [2, 0], sizes = [1, 128], strides = [1, 1]} : vector<3x128xf32> to vector<1x128xf32>
    %25 = arith.mulf %24, %22 : vector<1x128xf32>
    %26 = vector.extract_strided_slice %6 {offsets = [2, 0], sizes = [1, 128], strides = [1, 1]} : vector<3x128xf32> to vector<1x128xf32>
    %27 = arith.mulf %26, %23 : vector<1x128xf32>
    %28 = arith.addf %25, %27 : vector<1x128xf32>
    %29 = arith.addf %21, %28 : vector<1x128xf32>
    %c0_5 = arith.constant 0 : index
    %c0_6 = arith.constant 0 : index
    %30 = vector.load %arg4[%c0_5, %c0_6] : memref<1x128xf32, #tpu.memory_space<vmem>>, vector<1x128xf32>
    %31 = arith.addf %30, %29 : vector<1x128xf32>
    %c0_7 = arith.constant 0 : index
    %c0_8 = arith.constant 0 : index
    %32 = vector.load %arg4[%c0_7, %c0_8] : memref<1x128xf32, #tpu.memory_space<vmem>>, vector<1x128xf32>
    tpu.vector_store %arg4[%c0_7, %c0_8], %31 {strides = array<i32>} : memref<1x128xf32, #tpu.memory_space<vmem>>, vector<1x128xf32>,
    %c0_i32_9 = arith.constant 0 : i32
    %33 = arith.cmpi eq, %arg1, %c0_i32_9 : i32
    %34 = arith.extui %33 : i1 to i32
    %c0_i32_10 = arith.constant 0 : i32
    %35 = arith.cmpi ne, %34, %c0_i32_10 : i32
    scf.if %35 {
      %36 = tpu.iota {dimensions = array<i32: 0>} : vector<8x128xi32>
      %37 = tpu.iota {dimensions = array<i32: 1>} : vector<8x128xi32>
      %cst = arith.constant 0.000000e+00 : f32
      %38 = vector.broadcast %cst : f32 to vector<8x128xf32>
      %c0_11 = arith.constant 0 : index
      %c0_12 = arith.constant 0 : index
      %39 = vector.load %arg4[%c0_11, %c0_12] : memref<1x128xf32, #tpu.memory_space<vmem>>, vector<1x128xf32>
      %40 = vector.shape_cast %39 : vector<1x128xf32> to vector<1x1x128xf32>
      %cst_13 = arith.constant dense<0.000000e+00> : vector<1xf32>
      %41 = vector.multi_reduction <add>, %40, %cst_13 [1, 2] : vector<1x1x128xf32> to vector<1xf32>
      %42 = vector.shape_cast %41 : vector<1xf32> to vector<1x1x1xf32>
      %43 = vector.extract %42[0, 0, 0] : f32 from vector<1x1x1xf32>
      %c0_i32_14 = arith.constant 0 : i32
      %44 = vector.broadcast %c0_i32_14 : i32 to vector<8x128xi32>
      %45 = arith.cmpi eq, %36, %44 : vector<8x128xi32>
      %c0_i32_15 = arith.constant 0 : i32
      %46 = vector.broadcast %c0_i32_15 : i32 to vector<8x128xi32>
      %47 = arith.cmpi eq, %37, %46 : vector<8x128xi32>
      %48 = arith.andi %45, %47 : vector<8x128xi1>
      %49 = vector.broadcast %43 : f32 to vector<8x128xf32>
      %50 = arith.select %48, %49, %38 : vector<8x128xi1>, vector<8x128xf32>
      %c0_16 = arith.constant 0 : index
      %c0_17 = arith.constant 0 : index
      %51 = vector.load %arg3[%c0_16, %c0_17] : memref<8x128xf32, #tpu.memory_space<vmem>>, vector<8x128xf32>
      tpu.vector_store %arg3[%c0_16, %c0_17], %50 {strides = array<i32>} : memref<8x128xf32, #tpu.memory_space<vmem>>, vector<8x128xf32>,
    } else {
    }
    return
  }
  func.func @transform_0(%arg0: i32, %arg1: i32) -> (i32, i32, i32) {
    %c1_i32 = arith.constant 1 : i32
    %0 = arith.muli %arg0, %c1_i32 : i32
    %1 = arith.addi %0, %arg1 : i32
    %c0_i32 = arith.constant 0 : i32
    %c0_i32_0 = arith.constant 0 : i32
    %c0_i32_1 = arith.constant 0 : i32
    return %c0_i32, %c0_i32_0, %1 : i32, i32, i32
  }
  func.func @transform_1(%arg0: i32, %arg1: i32) -> (i32, i32) {
    %c0_i32 = arith.constant 0 : i32
    %c0_i32_0 = arith.constant 0 : i32
    return %arg0, %c0_i32 : i32, i32
  }
}

module attributes {stable_mosaic.version = 11 : i64} {
  func.func @kernel(%arg0: i32, %arg1: i32, %arg2: memref<2x3x128xf32, #tpu.memory_space<vmem>>, %arg3: memref<8x128xf32, #tpu.memory_space<vmem>>, %arg4: memref<1x128xf32, #tpu.memory_space<vmem>>) attributes {dimension_semantics = [#tpu.dimension_semantics<parallel>, #tpu.dimension_semantics<arbitrary>], iteration_bounds = array<i64: 1, 1>, scalar_prefetch = 0 : i64, scratch_operands = 1 : i64, tpu.core_type = #tpu.core_type<tc>, window_params = [{transform_indices = @transform_0, window_bounds = array<i64: 2, 3, 128>}, {transform_indices = @transform_1, window_bounds = array<i64: 8, 128>}]} {
    %c0_i32 = arith.constant 0 : i32
    %0 = arith.cmpi eq, %arg1, %c0_i32 : i32
    %1 = arith.extui %0 : i1 to i32
    %c0_i32_0 = arith.constant 0 : i32
    %2 = arith.cmpi ne, %1, %c0_i32_0 : i32
    scf.if %2 {
      %cst_12 = arith.constant 0.000000e+00 : f32
      %40 = vector.broadcast %cst_12 : f32 to vector<1x128xf32>
      %c0_13 = arith.constant 0 : index
      %c0_14 = arith.constant 0 : index
      %41 = vector.load %arg4[%c0_13, %c0_14] : memref<1x128xf32, #tpu.memory_space<vmem>>, vector<1x128xf32>
      tpu.vector_store %arg4[%c0_13, %c0_14], %40 {strides = array<i32>} : memref<1x128xf32, #tpu.memory_space<vmem>>, vector<1x128xf32>,
    } else {
    }
    %c0 = arith.constant 0 : index
    %c0_1 = arith.constant 0 : index
    %c0_2 = arith.constant 0 : index
    %3 = vector.load %arg2[%c0, %c0_1, %c0_2] : memref<2x3x128xf32, #tpu.memory_space<vmem>>, vector<1x3x128xf32>
    %4 = vector.shape_cast %3 : vector<1x3x128xf32> to vector<3x128xf32>
    %c1 = arith.constant 1 : index
    %c0_3 = arith.constant 0 : index
    %c0_4 = arith.constant 0 : index
    %5 = vector.load %arg2[%c1, %c0_3, %c0_4] : memref<2x3x128xf32, #tpu.memory_space<vmem>>, vector<1x3x128xf32>
    %6 = vector.shape_cast %5 : vector<1x3x128xf32> to vector<3x128xf32>
    %7 = vector.extract_strided_slice %4 {offsets = [0, 0], sizes = [1, 128], strides = [1, 1]} : vector<3x128xf32> to vector<1x128xf32>
    %8 = vector.extract_strided_slice %6 {offsets = [0, 0], sizes = [1, 128], strides = [1, 1]} : vector<3x128xf32> to vector<1x128xf32>
    %9 = vector.extract_strided_slice %4 {offsets = [0, 0], sizes = [1, 128], strides = [1, 1]} : vector<3x128xf32> to vector<1x128xf32>
    %10 = arith.mulf %9, %7 : vector<1x128xf32>
    %11 = vector.extract_strided_slice %6 {offsets = [0, 0], sizes = [1, 128], strides = [1, 1]} : vector<3x128xf32> to vector<1x128xf32>
    %12 = arith.mulf %11, %8 : vector<1x128xf32>
    %13 = arith.addf %10, %12 : vector<1x128xf32>
    %14 = vector.extract_strided_slice %4 {offsets = [1, 0], sizes = [1, 128], strides = [1, 1]} : vector<3x128xf32> to vector<1x128xf32>
    %15 = vector.extract_strided_slice %6 {offsets = [1, 0], sizes = [1, 128], strides = [1, 1]} : vector<3x128xf32> to vector<1x128xf32>
    %16 = vector.extract_strided_slice %4 {offsets = [1, 0], sizes = [1, 128], strides = [1, 1]} : vector<3x128xf32> to vector<1x128xf32>
    %17 = arith.mulf %16, %14 : vector<1x128xf32>
    %18 = vector.extract_strided_slice %6 {offsets = [1, 0], sizes = [1, 128], strides = [1, 1]} : vector<3x128xf32> to vector<1x128xf32>
    %19 = arith.mulf %18, %15 : vector<1x128xf32>
    %20 = arith.addf %17, %19 : vector<1x128xf32>
    %21 = arith.addf %13, %20 : vector<1x128xf32>
    %22 = vector.extract_strided_slice %4 {offsets = [2, 0], sizes = [1, 128], strides = [1, 1]} : vector<3x128xf32> to vector<1x128xf32>
    %23 = vector.extract_strided_slice %6 {offsets = [2, 0], sizes = [1, 128], strides = [1, 1]} : vector<3x128xf32> to vector<1x128xf32>
    %cst = arith.constant 0.000000e+00 : f32
    %24 = vector.broadcast %cst : f32 to vector<1x128xf32>
    %25 = arith.subf %24, %22 : vector<1x128xf32>
    %cst_5 = arith.constant 0.000000e+00 : f32
    %26 = vector.broadcast %cst_5 : f32 to vector<1x128xf32>
    %27 = arith.subf %26, %23 : vector<1x128xf32>
    %28 = vector.extract_strided_slice %4 {offsets = [2, 0], sizes = [1, 128], strides = [1, 1]} : vector<3x128xf32> to vector<1x128xf32>
    %29 = arith.mulf %28, %25 : vector<1x128xf32>
    %30 = vector.extract_strided_slice %6 {offsets = [2, 0], sizes = [1, 128], strides = [1, 1]} : vector<3x128xf32> to vector<1x128xf32>
    %31 = arith.mulf %30, %27 : vector<1x128xf32>
    %32 = arith.addf %29, %31 : vector<1x128xf32>
    %33 = arith.addf %21, %32 : vector<1x128xf32>
    %c0_6 = arith.constant 0 : index
    %c0_7 = arith.constant 0 : index
    %34 = vector.load %arg4[%c0_6, %c0_7] : memref<1x128xf32, #tpu.memory_space<vmem>>, vector<1x128xf32>
    %35 = arith.addf %34, %33 : vector<1x128xf32>
    %c0_8 = arith.constant 0 : index
    %c0_9 = arith.constant 0 : index
    %36 = vector.load %arg4[%c0_8, %c0_9] : memref<1x128xf32, #tpu.memory_space<vmem>>, vector<1x128xf32>
    tpu.vector_store %arg4[%c0_8, %c0_9], %35 {strides = array<i32>} : memref<1x128xf32, #tpu.memory_space<vmem>>, vector<1x128xf32>,
    %c0_i32_10 = arith.constant 0 : i32
    %37 = arith.cmpi eq, %arg1, %c0_i32_10 : i32
    %38 = arith.extui %37 : i1 to i32
    %c0_i32_11 = arith.constant 0 : i32
    %39 = arith.cmpi ne, %38, %c0_i32_11 : i32
    scf.if %39 {
      %40 = tpu.iota {dimensions = array<i32: 0>} : vector<8x128xi32>
      %41 = tpu.iota {dimensions = array<i32: 1>} : vector<8x128xi32>
      %cst_12 = arith.constant 0.000000e+00 : f32
      %42 = vector.broadcast %cst_12 : f32 to vector<8x128xf32>
      %c0_13 = arith.constant 0 : index
      %c0_14 = arith.constant 0 : index
      %43 = vector.load %arg4[%c0_13, %c0_14] : memref<1x128xf32, #tpu.memory_space<vmem>>, vector<1x128xf32>
      %44 = vector.shape_cast %43 : vector<1x128xf32> to vector<1x1x128xf32>
      %cst_15 = arith.constant dense<0.000000e+00> : vector<1xf32>
      %45 = vector.multi_reduction <add>, %44, %cst_15 [1, 2] : vector<1x1x128xf32> to vector<1xf32>
      %46 = vector.shape_cast %45 : vector<1xf32> to vector<1x1x1xf32>
      %47 = vector.extract %46[0, 0, 0] : f32 from vector<1x1x1xf32>
      %c0_i32_16 = arith.constant 0 : i32
      %48 = vector.broadcast %c0_i32_16 : i32 to vector<8x128xi32>
      %49 = arith.cmpi eq, %40, %48 : vector<8x128xi32>
      %c0_i32_17 = arith.constant 0 : i32
      %50 = vector.broadcast %c0_i32_17 : i32 to vector<8x128xi32>
      %51 = arith.cmpi eq, %41, %50 : vector<8x128xi32>
      %52 = arith.andi %49, %51 : vector<8x128xi1>
      %53 = vector.broadcast %47 : f32 to vector<8x128xf32>
      %54 = arith.select %52, %53, %42 : vector<8x128xi1>, vector<8x128xf32>
      %c0_18 = arith.constant 0 : index
      %c0_19 = arith.constant 0 : index
      %55 = vector.load %arg3[%c0_18, %c0_19] : memref<8x128xf32, #tpu.memory_space<vmem>>, vector<8x128xf32>
      tpu.vector_store %arg3[%c0_18, %c0_19], %54 {strides = array<i32>} : memref<8x128xf32, #tpu.memory_space<vmem>>, vector<8x128xf32>,
    } else {
    }
    return
  }
  func.func @transform_0(%arg0: i32, %arg1: i32) -> (i32, i32, i32) {
    %c1_i32 = arith.constant 1 : i32
    %0 = arith.muli %arg0, %c1_i32 : i32
    %1 = arith.addi %0, %arg1 : i32
    %c0_i32 = arith.constant 0 : i32
    %c0_i32_0 = arith.constant 0 : i32
    %c0_i32_1 = arith.constant 0 : i32
    return %c0_i32, %c0_i32_0, %1 : i32, i32, i32
  }
  func.func @transform_1(%arg0: i32, %arg1: i32) -> (i32, i32) {
    %c0_i32 = arith.constant 0 : i32
    %c0_i32_0 = arith.constant 0 : i32
    return %arg0, %c0_i32 : i32, i32
  }
}

</mosaic_0001>

<bundles_post_ra>
// kernel: _forward.6
= control target key start
LH: loop header
LB: loop body
LE: loop exit
PB: predicated region body
PF: predicated region fallthrough
CT: control target
= control target key end

     0   :  { %vm19_vm0 = vcmask 1040384   ;;  %vm21_vm1 = vcmask 1041408   ;;  %s62_s0 = inlined_call_operand.vmem [shape: f32[2,3,128], index: 0, kind: input, shape index: {}, may-alias: {0,1}]   ;;  %s63_s1 = inlined_call_operand.vmem [shape: f32[2,3,128], index: 1, kind: output, shape index: {}, may-alias: {0,1}]  }
   0x1   :  { %v8_v0 = vld [vmem:[%s62_s0] sm:$0x7]  ;;  %v38_v1 = vld [vmem:[%s62_s0 + $0x4] sm:$0x7] }
   0x2   :  { %v11_v2 = vsub.f32 0.0, %v8_v0  ;;  %v12_v3 = vsub.f32 0.0, %v38_v1  ;;  %v14_v4 = vrot.slane %v38_v1, 2  ;;  %v28_v5 = vrot.slane %v8_v0, 6 }
   0x4   :  { %v17_v6 = vrot.slane %v12_v3, 6  ;;  %v20_v7 = vsel %vm19_vm0, %v14_v4, %v8_v0  ;;  %v25_v8 = vrot.slane %v11_v2, 2 }
   0x6   :  { %v22_v9 = vsel %vm21_vm1, %v20_v7, %v17_v6  ;;  %v30_v10 = vsel %vm19_vm0, %v25_v8, %v38_v1 }
   0x7   :  { %23 = vst [vmem:[%s63_s1] sm:$0x7] %v22_v9  ;;  %v31_v11 = vsel %vm21_vm1, %v30_v10, %v28_v5 }
   0x8   :  { %39 = vst [vmem:[%s63_s1 + $0x4] sm:$0x7] %v31_v11 }

// kernel: _forward.7
= control target key start
LH: loop header
LB: loop body
LE: loop exit
PB: predicated region body
PF: predicated region fallthrough
CT: control target
= control target key end

     0   :  { %v132_v0 = vmov 0.0   ;;  %vm94_vm0 = vcmask 1040384   ;;  %v89_v33 = vlaneseq  ;;  %s163_s0 = inlined_call_operand.vmem [shape: f32[2,3,128], index: 0, kind: input, shape index: {}]   ;;  %s164_s1 = inlined_call_operand.vmem [shape: f32[2,3,128], index: 1, kind: input, shape index: {}]   ;;  %s165_s2 = inlined_call_operand.vmem [shape: f32[8,128], index: 2, kind: output, shape index: {}]  }
   0x1   :  { %49 = vst [vmem:[#allocation2] sm:$0x1] %v132_v0  ;;  %v50_v1 = vld [vmem:[%s164_s1] sm:$0x7]  ;;  %v127_v2 = vld [vmem:[%s164_s1 + $0x4] sm:$0x7] }
   0x2   :  { %v53_v3 = vld [vmem:[%s163_s0] sm:$0x7]  ;;  %v128_v4 = vld [vmem:[%s163_s0 + $0x4] sm:$0x7]  ;;  %v60_v6 = vrot.slane %v50_v1, 1  ;;  %v64_v7 = vrot.slane %v127_v2, 1 }
   0x3   :  { %v56_v5 = vmul.f32 %v53_v3, %v50_v1  ;;  %v72_v8 = vrot.slane %v50_v1, 7  ;;  %v57_v9 = vmul.f32 %v128_v4, %v127_v2  ;;  %v75_v10 = vrot.slane %v127_v2, 7 }
   0x4   :  { %v62_v11 = vmul.f32 %v60_v6, %v53_v3  ;;  %v66_v12 = vmul.f32 %v128_v4, %v64_v7  ;;  %v90_v34 = vshrl.u32 %v89_v33, 7  ;;  %v92_v35 = vand.u32 127, %v89_v33 }
   0x5   :  { %v74_v13 = vmul.f32 %v72_v8, %v53_v3  ;;  %v77_v14 = vmul.f32 %v128_v4, %v75_v10  ;;  %v58_v15 = vadd.f32 %v57_v9, %v56_v5 }
   0x6   :  { %v67_v16 = vadd.f32 %v66_v12, %v62_v11  ;;  %vm105_vm1 = vcmp.eq.s32.totalorder %v90_v34, 0  ;;  %vm106_vm2 = vcmp.eq.s32.totalorder %v92_v35, 0 }
   0x7   :  { %v78_v17 = vadd.f32 %v77_v14, %v74_v13  ;;  %vm107_vm3 = vmand %vm105_vm1, %vm106_vm2 }
   0x8   :  { %v69_v18 = vrot.slane %v67_v16, 1  ;;  %v83_v21 = vld [vmem:[#allocation2] sm:$0x1] }
   0x9   :  { %v80_v19 = vrot.slane %v78_v17, 2 }
   0xa   :  { %v71_v20 = vadd.f32 %v69_v18, %v58_v15 }
   0xc   :  { %v82_v22 = vadd.f32 %v80_v19, %v71_v20 }
   0xe   :  { %v84_v23 = vadd.f32 %v83_v21, %v82_v22 }
  0x10   :  { %85 = vst [vmem:[#allocation2] sm:$0x1] %v84_v23 }
  0x17   :  { %v93_v24 = vld [vmem:[#allocation2] sm:$0x1] }
  0x18   :  { %v95_v25 = vsel %vm94_vm0, %v93_v24, 0.0 }
  0x19   :  { %96 = vadd.xlane.f32.xlu0 %v95_v25 }
  0xa2   :  { %v97_v26 = vpop.xlane.xlu0 %96 }
  0xa3   :  { %v98_v27 = vrot.slane %v97_v26, 4 }
  0xa5   :  { %v99_v28 = vadd.f32 %v98_v27, %v97_v26 }
  0xa7   :  { %v100_v29 = vrot.slane %v99_v28, 2 }
  0xa9   :  { %v101_v30 = vadd.f32 %v100_v29, %v99_v28 }
  0xab   :  { %v102_v31 = vrot.slane %v101_v30, 1 }
  0xad   :  { %v103_v32 = vadd.f32 %v102_v31, %v101_v30 }
  0xaf   :  { %129 = vpush %v103_v32 }
  0xe0   :  { %s130_s0 = spop %129 }
  0xe1   :  { %v108_v36 = vstv %s130_s0 }
  0xe2   :  { %v109_v37 = vsel %vm107_vm3, %v108_v36, 0.0 }
  0xe3   :  { %110 = vst [vmem:[%s165_s2] sm:$0xff] %v109_v37 }

// kernel: _forward.5
= control target key start
LH: loop header
LB: loop body
LE: loop exit
PB: predicated region body
PF: predicated region fallthrough
CT: control target
= control target key end

     0   :  { %v92_v0 = vmov 0.0   ;;  %vm61_vm0 = vcmask 1040384   ;;  %v56_v25 = vlaneseq  ;;  %s112_s0 = inlined_call_operand.vmem [shape: f32[2,3,128], index: 0, kind: input, shape index: {}]   ;;  %s113_s1 = inlined_call_operand.vmem [shape: f32[8,128], index: 1, kind: output, shape index: {}]  }
   0x1   :  { %29 = vst [vmem:[#allocation2] sm:$0x1] %v92_v0  ;;  %v30_v1 = vld [vmem:[%s112_s0] sm:$0x7]  ;;  %v88_v2 = vld [vmem:[%s112_s0 + $0x4] sm:$0x7] }
   0x2   :  { %v34_v3 = vrot.slane %v30_v1, 1  ;;  %v38_v4 = vrot.slane %v88_v2, 1  ;;  %v43_v5 = vmul.f32 %v30_v1, %v30_v1  ;;  %v44_v6 = vmul.f32 %v88_v2, %v88_v2 }
   0x3   :  { %v57_v26 = vshrl.u32 %v56_v25, 7  ;;  %v59_v27 = vand.u32 127, %v56_v25 }
   0x4   :  { %v36_v7 = vmul.f32 %v34_v3, %v30_v1  ;;  %v40_v8 = vmul.f32 %v88_v2, %v38_v4  ;;  %v45_v9 = vadd.f32 %v44_v6, %v43_v5 }
   0x5   :  { %vm72_vm1 = vcmp.eq.s32.totalorder %v57_v26, 0  ;;  %vm73_vm2 = vcmp.eq.s32.totalorder %v59_v27, 0 }
   0x6   :  { %v41_v10 = vadd.f32 %v40_v8, %v36_v7  ;;  %v47_v11 = vrot.slane %v45_v9, 2  ;;  %vm74_vm3 = vmand %vm72_vm1, %vm73_vm2 }
   0x8   :  { %v42_v12 = vadd.f32 %v41_v10, %v41_v10  ;;  %v50_v13 = vld [vmem:[#allocation2] sm:$0x1] }
   0xa   :  { %v49_v14 = vadd.f32 %v47_v11, %v42_v12 }
   0xc   :  { %v51_v15 = vadd.f32 %v50_v13, %v49_v14 }
   0xe   :  { %52 = vst [vmem:[#allocation2] sm:$0x1] %v51_v15 }
  0x15   :  { %v60_v16 = vld [vmem:[#allocation2] sm:$0x1] }
  0x16   :  { %v62_v17 = vsel %vm61_vm0, %v60_v16, 0.0 }
  0x17   :  { %63 = vadd.xlane.f32.xlu0 %v62_v17 }
  0xa0   :  { %v64_v18 = vpop.xlane.xlu0 %63 }
  0xa1   :  { %v65_v19 = vrot.slane %v64_v18, 4 }
  0xa3   :  { %v66_v20 = vadd.f32 %v65_v19, %v64_v18 }
  0xa5   :  { %v67_v21 = vrot.slane %v66_v20, 2 }
  0xa7   :  { %v68_v22 = vadd.f32 %v67_v21, %v66_v20 }
  0xa9   :  { %v69_v23 = vrot.slane %v68_v22, 1 }
  0xab   :  { %v70_v24 = vadd.f32 %v69_v23, %v68_v22 }
  0xad   :  { %89 = vpush %v70_v24 }
  0xde   :  { %s90_s0 = spop %89 }
  0xdf   :  { %v75_v28 = vstv %s90_s0 }
  0xe0   :  { %v76_v29 = vsel %vm74_vm3, %v75_v28, 0.0 }
  0xe1   :  { %77 = vst [vmem:[%s113_s1] sm:$0xff] %v76_v29 }

// kernel: _forward.4
= control target key start
LH: loop header
LB: loop body
LE: loop exit
PB: predicated region body
PF: predicated region fallthrough
CT: control target
= control target key end

     0   :  { %v91_v0 = vmov 0.0   ;;  %vm60_vm0 = vcmask 1040384   ;;  %v55_v26 = vlaneseq  ;;  %s111_s0 = inlined_call_operand.vmem [shape: f32[2,3,128], index: 0, kind: input, shape index: {}]   ;;  %s112_s1 = inlined_call_operand.vmem [shape: f32[8,128], index: 1, kind: output, shape index: {}]  }
   0x1   :  { %29 = vst [vmem:[#allocation2] sm:$0x1] %v91_v0  ;;  %v30_v1 = vld [vmem:[%s111_s0] sm:$0x7]  ;;  %v87_v2 = vld [vmem:[%s111_s0 + $0x4] sm:$0x7] }
   0x2   :  { %v33_v3 = vmul.f32 %v30_v1, %v30_v1  ;;  %v34_v4 = vmul.f32 %v87_v2, %v87_v2  ;;  %v40_v5 = vsub.f32 0.0, %v30_v1  ;;  %v41_v6 = vsub.f32 0.0, %v87_v2 }
   0x3   :  { %v56_v27 = vshrl.u32 %v55_v26, 7  ;;  %v58_v28 = vand.u32 127, %v55_v26 }
   0x4   :  { %v35_v7 = vadd.f32 %v34_v4, %v33_v3  ;;  %v42_v8 = vmul.f32 %v40_v5, %v30_v1  ;;  %v43_v9 = vmul.f32 %v87_v2, %v41_v6 }
   0x5   :  { %vm71_vm1 = vcmp.eq.s32.totalorder %v56_v27, 0  ;;  %vm72_vm2 = vcmp.eq.s32.totalorder %v58_v28, 0 }
   0x6   :  { %v37_v10 = vrot.slane %v35_v7, 1  ;;  %v44_v11 = vadd.f32 %v43_v9, %v42_v8  ;;  %vm73_vm3 = vmand %vm71_vm1, %vm72_vm2 }
   0x8   :  { %v39_v12 = vadd.f32 %v37_v10, %v35_v7  ;;  %v46_v13 = vrot.slane %v44_v11, 2  ;;  %v49_v14 = vld [vmem:[#allocation2] sm:$0x1] }
   0xa   :  { %v48_v15 = vadd.f32 %v46_v13, %v39_v12 }
   0xc   :  { %v50_v16 = vadd.f32 %v49_v14, %v48_v15 }
   0xe   :  { %51 = vst [vmem:[#allocation2] sm:$0x1] %v50_v16 }
  0x15   :  { %v59_v17 = vld [vmem:[#allocation2] sm:$0x1] }
  0x16   :  { %v61_v18 = vsel %vm60_vm0, %v59_v17, 0.0 }
  0x17   :  { %62 = vadd.xlane.f32.xlu0 %v61_v18 }
  0xa0   :  { %v63_v19 = vpop.xlane.xlu0 %62 }
  0xa1   :  { %v64_v20 = vrot.slane %v63_v19, 4 }
  0xa3   :  { %v65_v21 = vadd.f32 %v64_v20, %v63_v19 }
  0xa5   :  { %v66_v22 = vrot.slane %v65_v21, 2 }
  0xa7   :  { %v67_v23 = vadd.f32 %v66_v22, %v65_v21 }
  0xa9   :  { %v68_v24 = vrot.slane %v67_v23, 1 }
  0xab   :  { %v69_v25 = vadd.f32 %v68_v24, %v67_v23 }
  0xad   :  { %88 = vpush %v69_v25 }
  0xde   :  { %s89_s0 = spop %88 }
  0xdf   :  { %v74_v29 = vstv %s89_s0 }
  0xe0   :  { %v75_v30 = vsel %vm73_vm3, %v74_v29, 0.0 }
  0xe1   :  { %76 = vst [vmem:[%s112_s1] sm:$0xff] %v75_v30 }

</bundles_post_ra>
